<compile_context>
chip_gen: v5e
topology: v5e:2x2
jax: 0.10.0
libtpu: 0.0.40
codegen_flags: <defaults>
</compile_context>

<pallas_src>
import jax
import jax.numpy as jnp
from jax.experimental import pallas as pl
from jax.experimental.pallas import tpu as pltpu

# ---- scaled-down dims consistent with the module ----
GNN_HIDDEN = 32       # args.gnn_hidden_dim == self.projector[0].in_features
PROJ_HIDDEN = 256     # stand-in for the hardcoded 2048 in nn.Linear(H, 2048)
LLM_DIM = 512         # stand-in for the hardcoded 4096 (LLaMA hidden size)
VOCAB = 64            # synthetic tokenizer vocab
MAX_TXT_LEN = 8       # args.max_txt_len
MAX_NEW_TOKENS = 4    # args.max_new_tokens
IGNORE_INDEX = -100
PAD_TOKEN_ID = 0
SUBLANE = 8


def _round_up(x, m):
    return (x + m - 1) // m * m


# --------------------------- Pallas kernels ---------------------------------

def graph_projector_kernel(x_ref, w1_ref, b1_ref, w2_ref, b2_ref, o_ref):
    """Fused encode_graphs (mean pool over all G*N nodes == scatter-mean over
    nodes followed by stack().mean over graphs) + projector
    Linear(H, PROJ_HIDDEN) -> Sigmoid -> Linear(PROJ_HIDDEN, LLM_DIM).
    Single grid step; bf16 MXU inputs, f32 accumulation, exact sigmoid.

    x  : (Bp, G*N, H) f32 node features (batch padded to a sublane multiple)
    w1 : (H, PROJ_HIDDEN) bf16       b1 : (1, PROJ_HIDDEN) f32
    w2 : (PROJ_HIDDEN, LLM_DIM) bf16 b2 : (1, LLM_DIM) f32
    o  : (Bp, LLM_DIM) f32
    """
    x = x_ref[...]
    gn = x.shape[1]
    g = jnp.sum(x, axis=1) * (1.0 / gn)                                # (Bp, H)
    h = jnp.dot(g.astype(jnp.bfloat16), w1_ref[...],
                preferred_element_type=jnp.float32) + b1_ref[...]      # (Bp, PROJ_HIDDEN)
    h = 1.0 / (1.0 + jnp.exp(-h))        # exact sigmoid (exp rides the EUP slot)
    y = jnp.dot(h.astype(jnp.bfloat16), w2_ref[...],
                preferred_element_type=jnp.float32) + b2_ref[...]      # (Bp, LLM_DIM)
    o_ref[...] = y


# --------------------------- wrappers ----------------------------------------

def encode_and_project_graphs(node_feats, w1, b1, w2, b2):
    """node_feats: (B, G, N, H) f32  ->  (Bp, LLM_DIM) f32 (first B rows valid)."""
    B, G, N, H = node_feats.shape
    x = node_feats.reshape(B, G * N, H)
    Bp = _round_up(max(B, SUBLANE), SUBLANE)   # sublane-dense rows -> unmasked stores
    if Bp != B:
        x = jnp.pad(x, ((0, Bp - B), (0, 0), (0, 0)))
    # Single grid step: whole working set (x 16 KiB + w1 16 KiB + w2 256 KiB +
    # biases + out 16 KiB) is far below VMEM, and the 512-wide output block is
    # lane-dense.  No dimension_semantics / vmem_limit needed at this size.
    out = pl.pallas_call(
        graph_projector_kernel,
        out_shape=jax.ShapeDtypeStruct((Bp, LLM_DIM), jnp.float32),
    )(x, w1, b1, w2, b2)
    return out


def assemble_inputs_embeds(ids_flat, graph_pos, table, graph_rows, n_graphs):
    """Batched word-embedding gather fused with graph-embedding insertion.

    ids_flat   : (T,) int32 token ids, already clipped to [0, VOCAB)
    graph_pos  : (n_graphs,) int32 flattened row index (into the T rows) of the
                 graph-embedding slot of each sample
    table      : (VOCAB, LLM_DIM) bf16 embedding table (VMEM resident)
    graph_rows : (Bp, LLM_DIM) f32 projected graph embeddings (first n_graphs valid)
    returns    : (Tp, LLM_DIM) table.dtype, first T rows valid
    """
    T = int(ids_flat.shape[0])
    V, D = table.shape
    Tp = _round_up(max(T, SUBLANE), SUBLANE)
    ids_col = jnp.pad(ids_flat, (0, Tp - T),
                      constant_values=PAD_TOKEN_ID).reshape(Tp, 1)

    def kernel(pos_ref, ids_ref, table_ref, graph_ref, o_ref):
        ids = ids_ref[...]                                               # (Tp, 1) int32
        lane = jax.lax.broadcasted_iota(jnp.int32, (Tp, V), 1)
        # One-hot gather against the VMEM-resident table: one MXU matmul with a
        # dense (Tp, D) result; exact (single 1.0 term per row, f32 accumulate).
        onehot = jnp.where(ids == lane, 1.0, 0.0).astype(table_ref.dtype)
        emb = jnp.dot(onehot, table_ref[...],
                      preferred_element_type=jnp.float32)                # (Tp, D) f32
        # Fused graph-slot insertion: overwrite n_graphs rows in-VMEM (no extra
        # full-buffer HBM pass).  Positions come from SMEM; loop is static.
        rows = jax.lax.broadcasted_iota(jnp.int32, (Tp, 1), 0)
        out = emb
        for b in range(n_graphs):
            out = jnp.where(rows == pos_ref[b], graph_ref[pl.ds(b, 1), :], out)
        o_ref[...] = out.astype(o_ref.dtype)                             # dense store

    return pl.pallas_call(
        kernel,
        out_shape=jax.ShapeDtypeStruct((Tp, D), table.dtype),
        in_specs=[
            pl.BlockSpec(memory_space=pltpu.MemorySpace.SMEM),   # graph_pos
            pl.BlockSpec(memory_space=pltpu.MemorySpace.VMEM),   # ids
            pl.BlockSpec(memory_space=pltpu.MemorySpace.VMEM),   # table
            pl.BlockSpec(memory_space=pltpu.MemorySpace.VMEM),   # graph rows
        ],
        out_specs=pl.BlockSpec(memory_space=pltpu.MemorySpace.VMEM),
    )(graph_pos, ids_col, table, graph_rows)


# --------------------------- GraphLLM.forward glue ---------------------------

def _pack_batch(samples):
    """Host-side tokenizer glue (mirrors the PyTorch forward's list handling).
    Uses a STATIC max length so kernel shapes never depend on batch data."""
    bos_ids = list(samples["bos_ids"])
    eos_user_ids = list(samples["eos_user_ids"])
    eos_ids = list(samples["eos_ids"])
    n_bos = len(bos_ids)
    batch_size = len(samples["input_ids"])
    L = n_bos + 1 + MAX_TXT_LEN + len(eos_user_ids) + MAX_NEW_TOKENS + len(eos_ids)

    id_rows, attn_rows, label_rows, graph_pos = [], [], [], []
    for i in range(batch_size):
        label_input_ids = list(samples["label_ids"][i][:MAX_NEW_TOKENS]) + eos_ids
        input_ids = (list(samples["input_ids"][i][:MAX_TXT_LEN])
                     + eos_user_ids + label_input_ids)
        seq_len = n_bos + 1 + len(input_ids)               # +1: graph-embedding slot
        pad_len = L - seq_len                              # left padding
        id_rows.append([PAD_TOKEN_ID] * pad_len + bos_ids + [PAD_TOKEN_ID] + input_ids)
        attn_rows.append([0] * pad_len + [1] * seq_len)
        label_rows.append([IGNORE_INDEX] * (L - len(label_input_ids)) + label_input_ids)
        graph_pos.append(pad_len + n_bos)                  # slot within the row
    return id_rows, attn_rows, label_rows, graph_pos, L


def graphllm_forward(params, samples):
    emb_table = params["emb_table"]                    # (VOCAB, LLM_DIM) bf16
    batch_size = len(samples["input_ids"])

    # graph_embeds = projector(encode_graphs(...).squeeze(1)) for the whole batch
    graph_embeds = encode_and_project_graphs(
        samples["graphs"], params["w1"], params["b1"], params["w2"], params["b2"]
    )                                                  # (Bp, LLM_DIM) f32

    id_rows, attn_rows, label_rows, graph_pos, L = _pack_batch(samples)

    ids_mat = jnp.asarray(id_rows, jnp.int32)                       # (B, L)
    # TODO(synk): real tokenizer ids >= VOCAB would be silently clipped to the
    # last row; map them to an UNK/pad row when wiring a real vocabulary.
    ids_flat = jnp.clip(ids_mat.reshape(-1), 0, VOCAB - 1)          # (B*L,)
    pos_flat = jnp.asarray([i * L + p for i, p in enumerate(graph_pos)], jnp.int32)

    packed = assemble_inputs_embeds(ids_flat, pos_flat, emb_table,
                                    graph_embeds, batch_size)       # (Tp, D) bf16
    inputs_embeds = packed[:batch_size * L].reshape(batch_size, L, LLM_DIM)

    attention_mask = jnp.asarray(attn_rows, jnp.int32)              # (B, L)
    label_input_ids = jnp.asarray(label_rows, jnp.int32)            # (B, L)

    # TODO(synk): self.model(inputs_embeds=..., attention_mask=..., labels=...)
    # (the pretrained LLaMA) is external; its loss is not reproduced here.
    return inputs_embeds, attention_mask, label_input_ids


# --------------------------- main --------------------------------------------

if __name__ == "__main__":
    key = jax.random.PRNGKey(0)
    k_g, k_e, k_w1, k_b1, k_w2, k_b2 = jax.random.split(key, 6)

    B, G, N = 2, 2, 8  # batch, graphs per sample, nodes per graph

    params = {
        # word embedding table (stand-in for model.get_input_embeddings()), bf16 checkpoint dtype
        "emb_table": (jax.random.normal(k_e, (VOCAB, LLM_DIM), jnp.float32) * 0.02
                      ).astype(jnp.bfloat16),
        # projector: Linear(GNN_HIDDEN, PROJ_HIDDEN) -> Sigmoid -> Linear(PROJ_HIDDEN, LLM_DIM)
        "w1": (jax.random.normal(k_w1, (GNN_HIDDEN, PROJ_HIDDEN), jnp.float32)
               * (1.0 / jnp.sqrt(GNN_HIDDEN))).astype(jnp.bfloat16),
        "b1": jax.random.normal(k_b1, (1, PROJ_HIDDEN), jnp.float32) * 0.01,
        "w2": (jax.random.normal(k_w2, (PROJ_HIDDEN, LLM_DIM), jnp.float32)
               * (1.0 / jnp.sqrt(PROJ_HIDDEN))).astype(jnp.bfloat16),
        "b2": jax.random.normal(k_b2, (1, LLM_DIM), jnp.float32) * 0.01,
    }

    samples = {
        # pre-encoded GNN node embeddings per sample/graph (B, G, N, GNN_HIDDEN)
        "graphs": jax.random.normal(k_g, (B, G, N, GNN_HIDDEN), jnp.float32),
        # synthetic tokenizer outputs (ids < VOCAB), deterministic
        "input_ids": [
            [7, 11, 13, 17, 19, 23, 29, 31],   # sample 0 (len 8)
            [9, 14, 21, 33, 40, 55],           # sample 1 (len 6, exercises left padding)
        ],
        "label_ids": [
            [3, 8, 12],
            [5, 6, 7],
        ],
        "bos_ids": [1, 60, 61],     # '<s>[INST]'
        "eos_user_ids": [62, 63],   # '[/INST]'
        "eos_ids": [2],             # '</s>'
    }

    inputs_embeds, attention_mask, label_input_ids = graphllm_forward(params, samples)
    jax.block_until_ready((inputs_embeds, attention_mask, label_input_ids))

    # ---- sanity checks against pure-JAX references of the Pallas hot paths ----
    # projector (mirror the bf16 casts of the kernel; sigmoid is exact)
    x2 = samples["graphs"].reshape(B, G * N, GNN_HIDDEN)
    g_ref = jnp.mean(x2, axis=1)
    h_ref = jax.nn.sigmoid(
        g_ref.astype(jnp.bfloat16).astype(jnp.float32)
        @ params["w1"].astype(jnp.float32) + params["b1"])
    y_ref = (h_ref.astype(jnp.bfloat16).astype(jnp.float32)
             @ params["w2"].astype(jnp.float32) + params["b2"])
    y_pal = encode_and_project_graphs(samples["graphs"], params["w1"], params["b1"],
                                      params["w2"], params["b2"])[:B]
    assert jnp.allclose(y_pal, y_ref, atol=2e-2, rtol=2e-2), "projector mismatch"

    # full assembled inputs_embeds vs pure-JAX reference (exact: the one-hot
    # gather and the f32 graph insert are bit-exact in bf16)
    id_rows, attn_rows, label_rows, graph_pos, L = _pack_batch(samples)
    ids_mat = jnp.clip(jnp.asarray(id_rows, jnp.int32), 0, VOCAB - 1)
    tok_ref = params["emb_table"][ids_mat]                            # (B, L, D) bf16
    is_graph = (jnp.arange(L)[None, :]
                == jnp.asarray(graph_pos, jnp.int32)[:, None])        # (B, L)
    embeds_ref = jnp.where(is_graph[..., None],
                           y_pal.astype(jnp.bfloat16)[:, None, :], tok_ref)
    assert jnp.array_equal(inputs_embeds.astype(jnp.float32),
                           embeds_ref.astype(jnp.float32)), "assembled embeds mismatch"

    # assembled sequence checks
    assert inputs_embeds.shape == (B, L, LLM_DIM)
    assert attention_mask.shape == (B, L) and label_input_ids.shape == (B, L)
    # both samples are left-padded to the static L -> first position is the pad embedding
    assert jnp.array_equal(inputs_embeds[1, 0].astype(jnp.float32),
                           params["emb_table"][PAD_TOKEN_ID].astype(jnp.float32))
    assert int(attention_mask[0, 0]) == 0 and int(attention_mask[1, 0]) == 0
    assert int(attention_mask[0].sum()) == 18 and int(attention_mask[1].sum()) == 16
    # graph embedding sits at its per-sample slot
    for i in range(B):
        assert jnp.array_equal(inputs_embeds[i, graph_pos[i]].astype(jnp.float32),
                               y_pal[i].astype(jnp.bfloat16).astype(jnp.float32))

    print("KERNEL_OK")
</pallas_src>

<mosaic_0001>
module attributes {stable_mosaic.version = 11 : i64} {
  func.func @graph_projector_kernel(%arg0: memref<8x16x32xf32, #tpu.memory_space<vmem>>, %arg1: memref<32x256xbf16, #tpu.memory_space<vmem>>, %arg2: memref<1x256xf32, #tpu.memory_space<vmem>>, %arg3: memref<256x512xbf16, #tpu.memory_space<vmem>>, %arg4: memref<1x512xf32, #tpu.memory_space<vmem>>, %arg5: memref<8x512xf32, #tpu.memory_space<vmem>>) attributes {dimension_semantics = [], scalar_prefetch = 0 : i64, scratch_operands = 0 : i64, tpu.core_type = #tpu.core_type<tc>} {
    %c0 = arith.constant 0 : index
    %c0_0 = arith.constant 0 : index
    %c0_1 = arith.constant 0 : index
    %0 = vector.load %arg0[%c0, %c0_0, %c0_1] : memref<8x16x32xf32, #tpu.memory_space<vmem>>, vector<8x16x32xf32>
    %cst = arith.constant dense<0.000000e+00> : vector<8x32xf32>
    %1 = vector.multi_reduction <add>, %0, %cst [1] : vector<8x16x32xf32> to vector<8x32xf32>
    %cst_2 = arith.constant 6.250000e-02 : f32
    %2 = vector.broadcast %cst_2 : f32 to vector<8x32xf32>
    %3 = arith.mulf %1, %2 : vector<8x32xf32>
    %4 = arith.truncf %3 : vector<8x32xf32> to vector<8x32xbf16>
    %c0_3 = arith.constant 0 : index
    %c0_4 = arith.constant 0 : index
    %5 = vector.load %arg1[%c0_3, %c0_4] : memref<32x256xbf16, #tpu.memory_space<vmem>>, vector<32x256xbf16>
    %cst_5 = arith.constant dense<0.000000e+00> : vector<8x256xf32>
    %6 = tpu.matmul %4, %5, %cst_5 {dimension_numbers = #tpu.dot_dimension_numbers<[1], [0], [0], [1], [0, 0, 1, 1], [], []>} : vector<8x32xbf16>, vector<32x256xbf16>, vector<8x256xf32> -> vector<8x256xf32>
    %c0_6 = arith.constant 0 : index
    %c0_7 = arith.constant 0 : index
    %7 = vector.load %arg2[%c0_6, %c0_7] : memref<1x256xf32, #tpu.memory_space<vmem>>, vector<1x256xf32>
    %8 = vector.broadcast %7 : vector<1x256xf32> to vector<8x256xf32>
    %9 = arith.addf %6, %8 : vector<8x256xf32>
    %cst_8 = arith.constant 0.000000e+00 : f32
    %10 = vector.broadcast %cst_8 : f32 to vector<8x256xf32>
    %11 = arith.subf %10, %9 : vector<8x256xf32>
    %12 = math.exp %11 : vector<8x256xf32>
    %cst_9 = arith.constant 1.000000e+00 : f32
    %13 = vector.broadcast %cst_9 : f32 to vector<8x256xf32>
    %14 = arith.addf %13, %12 : vector<8x256xf32>
    %cst_10 = arith.constant 1.000000e+00 : f32
    %15 = vector.broadcast %cst_10 : f32 to vector<8x256xf32>
    %16 = arith.divf %15, %14 : vector<8x256xf32>
    %17 = arith.truncf %16 : vector<8x256xf32> to vector<8x256xbf16>
    %c0_11 = arith.constant 0 : index
    %c0_12 = arith.constant 0 : index
    %18 = vector.load %arg3[%c0_11, %c0_12] : memref<256x512xbf16, #tpu.memory_space<vmem>>, vector<256x512xbf16>
    %cst_13 = arith.constant dense<0.000000e+00> : vector<8x512xf32>
    %19 = tpu.matmul %17, %18, %cst_13 {dimension_numbers = #tpu.dot_dimension_numbers<[1], [0], [0], [1], [0, 0, 1, 1], [], []>} : vector<8x256xbf16>, vector<256x512xbf16>, vector<8x512xf32> -> vector<8x512xf32>
    %c0_14 = arith.constant 0 : index
    %c0_15 = arith.constant 0 : index
    %20 = vector.load %arg4[%c0_14, %c0_15] : memref<1x512xf32, #tpu.memory_space<vmem>>, vector<1x512xf32>
    %21 = vector.broadcast %20 : vector<1x512xf32> to vector<8x512xf32>
    %22 = arith.addf %19, %21 : vector<8x512xf32>
    %c0_16 = arith.constant 0 : index
    %c0_17 = arith.constant 0 : index
    %23 = vector.load %arg5[%c0_16, %c0_17] : memref<8x512xf32, #tpu.memory_space<vmem>>, vector<8x512xf32>
    tpu.vector_store %arg5[%c0_16, %c0_17], %22 {strides = array<i32>} : memref<8x512xf32, #tpu.memory_space<vmem>>, vector<8x512xf32>,
    return
  }
}

</mosaic_0001>

<bundles_post_ra>
// kernel: tpu_custom_call.1
= control target key start
LH: loop header
LB: loop body
LE: loop exit
PB: predicated region body
PF: predicated region fallthrough
CT: control target
= control target key end

     0   :  { %10 = vsyncpa [#allocation3], 0  ;;  %s1450_s0 = inlined_call_operand.hbm [shape: f32[8,16,32], index: 0, kind: input, shape index: {}]   ;;  %s1451_s1 = inlined_call_operand.hbm [shape: bf16[32,256], index: 1, kind: input, shape index: {}]   ;;  %s1452_s2 = inlined_call_operand.hbm [shape: f32[1,256], index: 2, kind: input, shape index: {}]   ;;  %s1453_s3 = inlined_call_operand.hbm [shape: bf16[256,512], index: 3, kind: input, shape index: {}]   ;;  %s1454_s4 = inlined_call_operand.hbm [shape: f32[1,512], index: 4, kind: input, shape index: {}]   ;;  %s1455_s5 = inlined_call_operand.hbm [shape: f32[8,512], index: 5, kind: output, shape index: {}]  }
   0x1   :  { %11 = vsyncpa [#allocation6], 0 }
   0x2   :  { %12 = vsyncpa [#allocation9], 0 }
   0x3   :  { %13 = vsyncpa [#allocation4], 0  ;;  %s31_s20 = sshll.u32 %s1451_s1, 4  ;;  %s1364_s21 = smov [#allocation5]   ;;  %s32_s20 = int_to_ptr.hbm [resolvable:$true] %s31_s20 }
   0x4   :  { %s33_s22 = sshll.u32 %s1364_s21, 4  ;;  %s55_s25 = sshll.u32 %s1453_s3, 4  ;;  %s34_s22 = int_to_ptr.vmem [resolvable:$true] %s33_s22  ;;  %s56_s25 = int_to_ptr.hbm [resolvable:$true] %s55_s25 }
   0x5   :  { %s1365_s26 = smov 128   ;;  %s1366_s27 = smov 8  }
   0x6   :  { %39 = dma.hbm_to_vmem [thread:$0]  %s32_s20, 512, %s34_s22, [#allocation6], %s1365_s26, %s1365_s26, %s1366_s27  }
   0x7   :  { %s1367_s28 = smov [#allocation8]   ;;  %s1368_s30 = smov 256  }
   0x8   :  { %s57_s29 = sshll.u32 %s1367_s28, 4  ;;  %s1369_s6 = smov 16   ;;  %s58_s29 = int_to_ptr.vmem [resolvable:$true] %s57_s29 }
   0x9   :  { %63 = dma.hbm_to_vmem [thread:$0]  %s56_s25, 8192, %s58_s29, [#allocation9], %s1368_s30, %s1368_s30, %s1369_s6  }
   0xa   :  { %s18_s8 = sshll.u32 %s1450_s0, 4  ;;  %s1370_s9 = smov [#allocation2]   ;;  %s19_s8 = int_to_ptr.hbm [resolvable:$true] %s18_s8 }
   0xb   :  { %s20_s10 = sshll.u32 %s1370_s9, 4  ;;  %s45_s12 = sshll.u32 %s1452_s2, 4  ;;  %s21_s10 = int_to_ptr.vmem [resolvable:$true] %s20_s10  ;;  %s46_s12 = int_to_ptr.hbm [resolvable:$true] %s45_s12 }
   0xc   :  { %26 = dma.hbm_to_vmem [thread:$0]  %s19_s8, 2048, %s21_s10, [#allocation3], %s1365_s26, %s1365_s26, %s1366_s27  }
   0xd   :  { %s1371_s13 = smov [#allocation7]   ;;  %s69_s17 = sshll.u32 %s1454_s4, 4  ;;  %s70_s17 = int_to_ptr.hbm [resolvable:$true] %s69_s17 }
   0xe   :  { %s47_s14 = sshll.u32 %s1371_s13, 4  ;;  %s1372_s0 = smov [#allocation10]   ;;  %s48_s14 = int_to_ptr.vmem [resolvable:$true] %s47_s14 }
   0xf   :  { %50 = dma.hbm_to_vmem [thread:$0]  %s46_s12, 32, %s48_s14, [#allocation6]  }
  0x10   :  { %s71_s18 = sshll.u32 %s1372_s0, 4  ;;  %s72_s18 = int_to_ptr.vmem [resolvable:$true] %s71_s18 }
  0x11   :  { %74 = dma.hbm_to_vmem [thread:$0]  %s70_s17, 64, %s72_s18, [#allocation9]  }
  0x12   :  { %1356 = dma.done.wait [#allocation3], 2048  }
  0x13   :  { %1357 = vsyncadd [#allocation3], 4294965248 }
  0x14   :  { %1358 = dma.done.wait [#allocation6], 544  }
  0x15   :  { %1359 = vsyncadd [#allocation6], 4294966752 }
  0x16   :  { %1360 = dma.done.wait [#allocation9], 8256  }
  0x17   :  { %1361 = vsyncadd [#allocation9], 4294959040  ;;  %vm112_vm0 = vcmask 261120   ;;  %v862_v0 = vld [vmem:[#allocation5 + $0x10] sm:$0xf]  ;;  %v96_v10 = vld [vmem:[#allocation2] sm:$0xff] }
  0x18   :  { %v1129_v1 = vld [vmem:[#allocation5 + $0x14] sm:$0xf0]  ;;  %v1128_v2 = vld [vmem:[#allocation5 + $0x14] sm:$0xf]  ;;  %v864_v4 = vld [vmem:[#allocation5 + $0x18] sm:$0xf0] }
  0x19   :  { %v863_v3 = vor.u32 %v1129_v1, %v862_v0  ;;  %v854_v5 = vld [vmem:[#allocation5] sm:$0xf]  ;;  %v1127_v6 = vld [vmem:[#allocation5 + $0x4] sm:$0xf0]  ;;  %v867_v7 = vor.u32 %v1128_v2, %v864_v4  ;;  %v1126_v8 = vld [vmem:[#allocation5 + $0x4] sm:$0xf] }
  0x1a   :  { %v856_v9 = vld [vmem:[#allocation5 + $0x8] sm:$0xf0]  ;;  %v855_v11 = vor.u32 %v1127_v6, %v854_v5  ;;  %v98_v13 = vld [vmem:[#allocation2 + $0x10] sm:$0xff]  ;;  %v99_v14 = vld [vmem:[#allocation2 + $0x18] sm:$0xff]  ;;  %v113_v15 = vsel %vm112_vm0, %v96_v10, 0.0  ;;  %vm227_vm1 = vcmask 1041409  }
  0x1b   :  { %271 = vmatpush.bf16.msra.mxu0 %v863_v3  ;;  %v97_v12 = vld [vmem:[#allocation2 + $0x8] sm:$0xff]  ;;  %284 = vmatpush.bf16.msra.mxu1 %v867_v7  ;;  %v859_v16 = vor.u32 %v1126_v8, %v856_v9  ;;  %v100_v17 = vld [vmem:[#allocation2 + $0x20] sm:$0xff]  ;;  %v102_v19 = vld [vmem:[#allocation2 + $0x30] sm:$0xff]  ;;  %v122_v21 = vsel %vm112_vm0, %v98_v13, 0.0  ;;  %v123_v22 = vsel %vm112_vm0, %v99_v14, 0.0  ;;  %vm229_vm2 = vcmask 1042434  }
  0x1c   :  { %v101_v18 = vld [vmem:[#allocation2 + $0x28] sm:$0xff]  ;;  %v114_v20 = vsel %vm112_vm0, %v97_v12, 0.0  ;;  %v103_v23 = vld [vmem:[#allocation2 + $0x38] sm:$0xff]  ;;  %v104_v24 = vld [vmem:[#allocation2 + $0x40] sm:$0xff]  ;;  %v124_v27 = vadd.f32 %v123_v22, %v122_v21  ;;  %v131_v28 = vsel %vm112_vm0, %v100_v17, 0.0  ;;  %v140_v33 = vsel %vm112_vm0, %v102_v19, 0.0 }
  0x1d   :  { %v105_v25 = vld [vmem:[#allocation2 + $0x48] sm:$0xff]  ;;  %v115_v26 = vadd.f32 %v114_v20, %v113_v15  ;;  %v132_v29 = vsel %vm112_vm0, %v101_v18, 0.0  ;;  %v106_v30 = vld [vmem:[#allocation2 + $0x50] sm:$0xff]  ;;  %v107_v31 = vld [vmem:[#allocation2 + $0x58] sm:$0xff]  ;;  %v141_v34 = vsel %vm112_vm0, %v103_v23, 0.0  ;;  %v149_v35 = vsel %vm112_vm0, %v104_v24, 0.0 }
  0x1e   :  { %v133_v32 = vadd.f32 %v132_v29, %v131_v28  ;;  %v108_v36 = vld [vmem:[#allocation2 + $0x60] sm:$0xff]  ;;  %v109_v37 = vld [vmem:[#allocation2 + $0x68] sm:$0xff]  ;;  %v125_v39 = vrot.slane %v124_v27, 4  ;;  %v142_v40 = vadd.f32 %v141_v34, %v140_v33  ;;  %v150_v41 = vsel %vm112_vm0, %v105_v25, 0.0  ;;  %v110_v46 = vld [vmem:[#allocation2 + $0x70] sm:$0xff]  ;;  %s1373_s2 = smov [#allocation11]  }
  0x1f   :  { %272 = vmatpush.bf16.msra.mxu0 %v855_v11  ;;  %v116_v38 = vrot.slane %v115_v26, 4  ;;  %285 = vmatpush.bf16.msra.mxu1 %v859_v16  ;;  %v151_v43 = vadd.f32 %v150_v41, %v149_v35  ;;  %v158_v44 = vsel %vm112_vm0, %v106_v30, 0.0  ;;  %v159_v45 = vsel %vm112_vm0, %v107_v31, 0.0  ;;  %v111_v55 = vld [vmem:[#allocation2 + $0x78] sm:$0xff]  ;;  %s838_s4 = sshll.u32 %s1373_s2, 4  ;;  %s840_s21 = sshll.u32 %s1455_s5, 4  ;;  %s839_s4 = int_to_ptr.vmem [resolvable:$true] %s838_s4  ;;  %s841_s21 = int_to_ptr.hbm [resolvable:$true] %s840_s21 }
  0x20   :  { %v134_v42 = vrot.slane %v133_v32, 4  ;;  %v126_v48 = vadd.f32 %v125_v39, %v124_v27  ;;  %v143_v49 = vrot.slane %v142_v40, 4  ;;  %v160_v50 = vadd.f32 %v159_v45, %v158_v44  ;;  %v1160_v45 = vld [vmem:[#allocation8 + $0xec] sm:$0xf0] }
  0x21   :  { %v117_v47 = vadd.f32 %v116_v38, %v115_v26  ;;  %v152_v52 = vrot.slane %v151_v43, 4  ;;  %v167_v53 = vsel %vm112_vm0, %v108_v36, 0.0  ;;  %v168_v54 = vsel %vm112_vm0, %v109_v37, 0.0 }
  0x22   :  { %v135_v51 = vadd.f32 %v134_v42, %v133_v32  ;;  %v127_v57 = vrot.slane %v126_v48, 2  ;;  %v144_v58 = vadd.f32 %v143_v49, %v142_v40  ;;  %v161_v59 = vrot.slane %v160_v50, 4  ;;  %v984_v40 = vld [vmem:[#allocation8 + $0xe0] sm:$0xf] }
  0x23   :  { %v118_v56 = vrot.slane %v117_v47, 2  ;;  %v153_v61 = vadd.f32 %v152_v52, %v151_v43  ;;  %v169_v62 = vadd.f32 %v168_v54, %v167_v53  ;;  %v176_v63 = vsel %vm112_vm0, %v110_v46, 0.0  ;;  %v1112_v46 = vld [vmem:[#allocation8 + $0x1e0] sm:$0xf]  ;;  %v1158_v52 = vld [vmem:[#allocation8 + $0xe4] sm:$0xf] }
  0x24   :  { %v136_v60 = vrot.slane %v135_v51, 2  ;;  %v128_v1 = vadd.f32 %v127_v57, %v126_v48  ;;  %v145_v2 = vrot.slane %v144_v58, 2  ;;  %v162_v3 = vadd.f32 %v161_v59, %v160_v50  ;;  %v986_v53 = vld [vmem:[#allocation8 + $0xf0] sm:$0xf0]  ;;  %v1190_v57 = vld [vmem:[#allocation8 + $0x1e4] sm:$0xf] }
  0x25   :  { %v119_v0 = vadd.f32 %v118_v56, %v117_v47  ;;  %v154_v5 = vrot.slane %v153_v61, 2  ;;  %v170_v6 = vrot.slane %v169_v62, 4  ;;  %v177_v7 = vsel %vm112_vm0, %v111_v55, 0.0  ;;  %v968_v59 = vld [vmem:[#allocation8 + $0xc0] sm:$0xf] }
  0x26   :  { %v137_v4 = vadd.f32 %v136_v60, %v135_v51  ;;  %v129_v9 = vrot.slane %v128_v1, 1  ;;  %v146_v10 = vadd.f32 %v145_v2, %v144_v58  ;;  %v163_v11 = vrot.slane %v162_v3, 2  ;;  %v1192_v51 = vld [vmem:[#allocation8 + $0x1ec] sm:$0xf0]  ;;  %v1114_v58 = vld [vmem:[#allocation8 + $0x1f0] sm:$0xf0] }
  0x27   :  { %v120_v8 = vrot.slane %v119_v0, 1  ;;  %v155_v13 = vadd.f32 %v154_v5, %v153_v61  ;;  %v171_v14 = vadd.f32 %v170_v6, %v169_v62  ;;  %v178_v15 = vadd.f32 %v177_v7, %v176_v63  ;;  %v1188_v6 = vld [vmem:[#allocation8 + $0x1cc] sm:$0xf0]  ;;  %v1154_v7 = vld [vmem:[#allocation8 + $0xc4] sm:$0xf] }
  0x28   :  { %v138_v12 = vrot.slane %v137_v4, 1  ;;  %vm231_vm3 = vcmask 1043459   ;;  %v130_v17 = vadd.f32 %v129_v9, %v128_v1  ;;  %v147_v18 = vrot.slane %v146_v10, 1  ;;  %v1096_v1 = vld [vmem:[#allocation8 + $0x1c0] sm:$0xf] }
  0x29   :  { %v121_v16 = vadd.f32 %v120_v8, %v119_v0  ;;  %v164_v19 = vadd.f32 %v163_v11, %v162_v3  ;;  %vm233_vm4 = vcmask 1044484   ;;  %v156_v21 = vrot.slane %v155_v13, 1  ;;  %v1156_v0 = vld [vmem:[#allocation8 + $0xcc] sm:$0xf0]  ;;  %v970_v8 = vld [vmem:[#allocation8 + $0xd0] sm:$0xf0] }
  0x2a   :  { %v139_v20 = vadd.f32 %v138_v12, %v137_v4  ;;  %v172_v22 = vrot.slane %v171_v14, 2  ;;  %v179_v23 = vrot.slane %v178_v15, 4  ;;  %vm235_vm5 = vcmask 1045509  }
  0x2b   :  { %v148_v24 = vadd.f32 %v147_v18, %v146_v10  ;;  %v165_v25 = vrot.slane %v164_v19, 1  ;;  %v185_v26 = vmul.f32 0.0625, %v121_v16  ;;  %v186_v27 = vmul.f32 0.0625, %v130_v17  ;;  %v952_v18 = vld [vmem:[#allocation8 + $0xa0] sm:$0xf] }
  0x2c   :  { %v157_v28 = vadd.f32 %v156_v21, %v155_v13  ;;  %v173_v29 = vadd.f32 %v172_v22, %v171_v14  ;;  %v180_v30 = vadd.f32 %v179_v23, %v178_v15  ;;  %v187_v31 = vmul.f32 0.0625, %v139_v20  ;;  %v1186_v13 = vld [vmem:[#allocation8 + $0x1c4] sm:$0xf]  ;;  %v1098_v14 = vld [vmem:[#allocation8 + $0x1d0] sm:$0xf0] }
  0x2d   :  { %v166_v32 = vadd.f32 %v165_v25, %v164_v19  ;;  %v188_v33 = vmul.f32 0.0625, %v148_v24  ;;  %v193_v34 = vpack.c.bf16 %v185_v26, %v185_v26  ;;  %v194_v35 = vpack.c.bf16 %v186_v27, %v186_v27  ;;  %v1152_v19 = vld [vmem:[#allocation8 + $0xac] sm:$0xf0]  ;;  %v1080_v24 = vld [vmem:[#allocation8 + $0x1a0] sm:$0xf] }
  0x2e   :  { %v174_v36 = vrot.slane %v173_v29, 1  ;;  %v181_v37 = vrot.slane %v180_v30, 2  ;;  %v189_v38 = vmul.f32 0.0625, %v157_v28  ;;  %v195_v39 = vpack.c.bf16 %v187_v31, %v187_v31  ;;  %v1184_v25 = vld [vmem:[#allocation8 + $0x1ac] sm:$0xf0] }
  0x2f   :  { %v190_v41 = vmul.f32 0.0625, %v166_v32  ;;  %v196_v42 = vpack.c.bf16 %v188_v33, %v188_v33  ;;  %v219_v43 = vunpack.c.l.b16 %v193_v34  ;;  %v220_v44 = vunpack.c.l.b16 %v194_v35  ;;  %v1150_v27 = vld [vmem:[#allocation8 + $0xa4] sm:$0xf]  ;;  %v954_v28 = vld [vmem:[#allocation8 + $0xb0] sm:$0xf0] }
  0x30   :  { %v175_v47 = vadd.f32 %v174_v36, %v173_v29  ;;  %v182_v48 = vadd.f32 %v181_v37, %v180_v30  ;;  %v197_v49 = vpack.c.bf16 %v189_v38, %v189_v38  ;;  %v221_v50 = vunpack.c.l.b16 %v195_v39  ;;  %v1182_v33 = vld [vmem:[#allocation8 + $0x1a4] sm:$0xf]  ;;  %v1082_v34 = vld [vmem:[#allocation8 + $0x1b0] sm:$0xf0] }
  0x31   :  { %v198_v54 = vpack.c.bf16 %v190_v41, %v190_v41  ;;  %v222_v55 = vunpack.c.l.b16 %v196_v42  ;;  %v228_v56 = vsel %vm227_vm1, %v220_v44, %v219_v43  ;;  %v985_v4 = vor.u32 %v1160_v45, %v984_v40  ;;  %v936_v40 = vld [vmem:[#allocation8 + $0x80] sm:$0xf]  ;;  %v1148_v41 = vld [vmem:[#allocation8 + $0x8c] sm:$0xf0]  ;;  %v1146_v45 = vld [vmem:[#allocation8 + $0x84] sm:$0xf] }
  0x32   :  { %v183_v60 = vrot.slane %v182_v48, 1  ;;  %v191_v61 = vmul.f32 0.0625, %v175_v47  ;;  %v223_v62 = vunpack.c.l.b16 %v197_v49  ;;  %v230_v63 = vsel %vm229_vm2, %v221_v50, %v228_v56  ;;  %v1064_v42 = vld [vmem:[#allocation8 + $0x180] sm:$0xf]  ;;  %v1180_v44 = vld [vmem:[#allocation8 + $0x18c] sm:$0xf0] }
  0x33   :  { %v224_v2 = vunpack.c.l.b16 %v198_v54  ;;  %v232_v3 = vsel %vm231_vm3, %v222_v55, %v230_v63  ;;  %v1113_v5 = vor.u32 %v1192_v51, %v1112_v46  ;;  %v989_v12 = vor.u32 %v1158_v52, %v986_v53  ;;  %725 = vmatpush.bf16.msra.mxu2 %v985_v4  ;;  %v938_v46 = vld [vmem:[#allocation8 + $0x90] sm:$0xf0]  ;;  %v1178_v49 = vld [vmem:[#allocation8 + $0x184] sm:$0xf]  ;;  %v920_v52 = vld [vmem:[#allocation8 + $0x60] sm:$0xf] }
  0x34   :  { %v184_v9 = vadd.f32 %v183_v60, %v182_v48  ;;  %v199_v10 = vpack.c.bf16 %v191_v61, %v191_v61  ;;  %v234_v11 = vsel %vm233_vm4, %v223_v62, %v232_v3  ;;  %vm237_vm6 = vcmask 1046534   ;;  %v1066_v50 = vld [vmem:[#allocation8 + $0x190] sm:$0xf0]  ;;  %v1144_v53 = vld [vmem:[#allocation8 + $0x6c] sm:$0xf0] }
  0x35   :  { %v236_v15 = vsel %vm235_vm5, %v224_v2, %v234_v11  ;;  %738 = vmatpush.bf16.msra.mxu3 %v1113_v5  ;;  %v1117_v16 = vor.u32 %v1190_v57, %v1114_v58  ;;  %v969_v17 = vor.u32 %v1156_v0, %v968_v59  ;;  %751 = vmatpush.bf16.msrb.mxu0 %v989_v12  ;;  %vm239_vm7 = vcmask 1047559   ;;  %v1048_v54 = vld [vmem:[#allocation8 + $0x160] sm:$0xf]  ;;  %v1176_v56 = vld [vmem:[#allocation8 + $0x16c] sm:$0xf0] }
  0x36   :  { %v192_v20 = vmul.f32 0.0625, %v184_v9  ;;  %v225_v21 = vunpack.c.l.b16 %v199_v10  ;;  %v1097_v22 = vor.u32 %v1188_v6, %v1096_v1  ;;  %v973_v23 = vor.u32 %v1154_v7, %v970_v8  ;;  %v1142_v57 = vld [vmem:[#allocation8 + $0x64] sm:$0xf]  ;;  %v922_v58 = vld [vmem:[#allocation8 + $0x70] sm:$0xf0] }
  0x37   :  { %764 = vmatpush.bf16.msrb.mxu1 %v1117_v16  ;;  %v1101_v26 = vor.u32 %v1186_v13, %v1098_v14  ;;  %726 = vmatpush.bf16.msra.mxu2 %v969_v17  ;;  %v953_v31 = vor.u32 %v1152_v19, %v952_v18  ;;  %v1081_v32 = vor.u32 %v1184_v25, %v1080_v24  ;;  %v1174_v61 = vld [vmem:[#allocation8 + $0x164] sm:$0xf]  ;;  %v1050_v62 = vld [vmem:[#allocation8 + $0x170] sm:$0xf0]  ;;  %v904_v0 = vld [vmem:[#allocation8 + $0x40] sm:$0xf] }
  0x38   :  { %v200_v29 = vpack.c.bf16 %v192_v20, %v192_v20  ;;  %v238_v30 = vsel %vm237_vm6, %v225_v21, %v236_v15  ;;  %v957_v36 = vor.u32 %v1150_v27, %v954_v28  ;;  %v1085_v38 = vor.u32 %v1182_v33, %v1082_v34  ;;  %v1140_v1 = vld [vmem:[#allocation8 + $0x4c] sm:$0xf0]  ;;  %v1032_v2 = vld [vmem:[#allocation8 + $0x140] sm:$0xf]  ;;  %v1138_v5 = vld [vmem:[#allocation8 + $0x44] sm:$0xf] }
  0x39   :  { %739 = vmatpush.bf16.msra.mxu3 %v1097_v22  ;;  %752 = vmatpush.bf16.msrb.mxu0 %v973_v23  ;;  %v937_v43 = vor.u32 %v1148_v41, %v936_v40  ;;  %v1065_v47 = vor.u32 %v1180_v44, %v1064_v42  ;;  %v941_v48 = vor.u32 %v1146_v45, %v938_v46  ;;  %v1172_v4 = vld [vmem:[#allocation8 + $0x14c] sm:$0xf0]  ;;  %v906_v6 = vld [vmem:[#allocation8 + $0x50] sm:$0xf0]  ;;  %v1170_v9 = vld [vmem:[#allocation8 + $0x144] sm:$0xf] }
  0x3a   :  { %v226_v35 = vunpack.c.l.b16 %v200_v29  ;;  %v1069_v51 = vor.u32 %v1178_v49, %v1066_v50  ;;  %v921_v55 = vor.u32 %v1144_v53, %v920_v52  ;;  %v1049_v59 = vor.u32 %v1176_v56, %v1048_v54  ;;  %v1034_v10 = vld [vmem:[#allocation8 + $0x150] sm:$0xf0]  ;;  %v888_v12 = vld [vmem:[#allocation8 + $0x20] sm:$0xf]  ;;  %v1136_v13 = vld [vmem:[#allocation8 + $0x2c] sm:$0xf0] }
  0x3b   :  { %765 = vmatpush.bf16.msrb.mxu1 %v1101_v26  ;;  %727 = vmatpush.bf16.msra.mxu2 %v953_v31  ;;  %v925_v60 = vor.u32 %v1142_v57, %v922_v58  ;;  %v1053_v63 = vor.u32 %v1174_v61, %v1050_v62  ;;  %v905_v3 = vor.u32 %v1140_v1, %v904_v0  ;;  %v1016_v14 = vld [vmem:[#allocation8 + $0x120] sm:$0xf]  ;;  %v1168_v16 = vld [vmem:[#allocation8 + $0x12c] sm:$0xf0]  ;;  %v1134_v17 = vld [vmem:[#allocation8 + $0x24] sm:$0xf] }
  0x3c   :  { %v240_v37 = vsel %vm239_vm7, %v226_v35, %v238_v30  ;;  %v1033_v7 = vor.u32 %v1172_v4, %v1032_v2  ;;  %v909_v8 = vor.u32 %v1138_v5, %v906_v6  ;;  %v1037_v11 = vor.u32 %v1170_v9, %v1034_v10  ;;  %v890_v18 = vld [vmem:[#allocation8 + $0x30] sm:$0xf0]  ;;  %v1166_v21 = vld [vmem:[#allocation8 + $0x124] sm:$0xf]  ;;  %v872_v24 = vld [vmem:[#allocation8] sm:$0xf] }
  0x3d   :  { %v241_v39 = vpack.c.b16 %v240_v37, %v240_v37  ;;  %740 = vmatpush.bf16.msra.mxu3 %v1081_v32  ;;  %753 = vmatpush.bf16.msrb.mxu0 %v957_v36  ;;  %v889_v15 = vor.u32 %v1136_v13, %v888_v12  ;;  %v1017_v19 = vor.u32 %v1168_v16, %v1016_v14  ;;  %v1018_v22 = vld [vmem:[#allocation8 + $0x130] sm:$0xf0]  ;;  %v1132_v25 = vld [vmem:[#allocation8 + $0xc] sm:$0xf0]  ;;  %v1000_v26 = vld [vmem:[#allocation8 + $0x100] sm:$0xf] }
  0x3e   :  { %v893_v20 = vor.u32 %v1134_v17, %v890_v18  ;;  %v1021_v23 = vor.u32 %v1166_v21, %v1018_v22  ;;  %v873_v27 = vor.u32 %v1132_v25, %v872_v24  ;;  %v1164_v28 = vld [vmem:[#allocation8 + $0x10c] sm:$0xf0]  ;;  %v1130_v29 = vld [vmem:[#allocation8 + $0x4] sm:$0xf]  ;;  %v874_v30 = vld [vmem:[#allocation8 + $0x10] sm:$0xf0] }
  0x3f   :  { %868 = vmatmul.msk.bf16.vlgmr.msra.gmra.mxu0 %vm112_vm0, %v241_v39  ;;  %869 = vmatmul.msk.bf16.vlgmr.msra.gmra.mxu1 %vm112_vm0, %v241_v39  ;;  %v1001_v31 = vor.u32 %v1164_v28, %v1000_v26  ;;  %v877_v32 = vor.u32 %v1130_v29, %v874_v30  ;;  %v1162_v33 = vld [vmem:[#allocation8 + $0x104] sm:$0xf]  ;;  %v1002_v34 = vld [vmem:[#allocation8 + $0x110] sm:$0xf0]  ;;  %v992_v35 = vld [vmem:[#allocation8 + $0xe8] sm:$0xf] }
  0x40   :  { %766 = vmatpush.bf16.msrb.mxu1 %v1085_v38  ;;  %728 = vmatpush.bf16.msra.mxu2 %v937_v43  ;;  %v1443_v36 = vld [vmem:[#allocation7] sm:$0x3]  ;;  %v1005_v37 = vor.u32 %v1162_v33, %v1002_v34  ;;  %v1161_v38 = vld [vmem:[#allocation8 + $0xf4] sm:$0xf0]  ;;  %v1120_v39 = vld [vmem:[#allocation8 + $0x1e8] sm:$0xf] }
  0x41   :  { %741 = vmatpush.bf16.msra.mxu3 %v1065_v47  ;;  %754 = vmatpush.bf16.msrb.mxu0 %v941_v48  ;;  %v1193_v40 = vld [vmem:[#allocation8 + $0x1f4] sm:$0xf0]  ;;  %v993_v41 = vor.u32 %v1161_v38, %v992_v35  ;;  %v1159_v43 = vld [vmem:[#allocation8 + $0xec] sm:$0xf]  ;;  %v994_v44 = vld [vmem:[#allocation8 + $0xf8] sm:$0xf0] }
  0x42   :  { %v1121_v42 = vor.u32 %v1193_v40, %v1120_v39  ;;  %v1191_v45 = vld [vmem:[#allocation8 + $0x1ec] sm:$0xf]  ;;  %v997_v46 = vor.u32 %v1159_v43, %v994_v44  ;;  %v1122_v47 = vld [vmem:[#allocation8 + $0x1f8] sm:$0xf0]  ;;  %v976_v48 = vld [vmem:[#allocation8 + $0xc8] sm:$0xf] }
  0x43   :  { %v1157_v49 = vld [vmem:[#allocation8 + $0xd4] sm:$0xf0]  ;;  %v1125_v50 = vor.u32 %v1191_v45, %v1122_v47  ;;  %v1104_v52 = vld [vmem:[#allocation8 + $0x1c8] sm:$0xf]  ;;  %v1155_v54 = vld [vmem:[#allocation8 + $0xcc] sm:$0xf] }
  0x44   :  { %767 = vmatpush.bf16.msrb.mxu1 %v1069_v51  ;;  %729 = vmatpush.bf16.msra.mxu2 %v921_v55  ;;  %v977_v51 = vor.u32 %v1157_v49, %v976_v48  ;;  %v1189_v53 = vld [vmem:[#allocation8 + $0x1d4] sm:$0xf0]  ;;  %v978_v56 = vld [vmem:[#allocation8 + $0xd8] sm:$0xf0]  ;;  %v1187_v57 = vld [vmem:[#allocation8 + $0x1cc] sm:$0xf] }
  0x45   :  { %742 = vmatpush.bf16.msra.mxu3 %v1049_v59  ;;  %755 = vmatpush.bf16.msrb.mxu0 %v925_v60  ;;  %v1105_v55 = vor.u32 %v1189_v53, %v1104_v52  ;;  %v1106_v58 = vld [vmem:[#allocation8 + $0x1d8] sm:$0xf0]  ;;  %v207_v59 = vperm.slane %v1443_v36, 0  ;;  %v208_v60 = vperm.slane %v1443_v36, 1  ;;  %v981_v61 = vor.u32 %v1155_v54, %v978_v56  ;;  %v1153_v0 = vld [vmem:[#allocation8 + $0xb4] sm:$0xf0] }
  0x46   :  { %v1109_v62 = vor.u32 %v1187_v57, %v1106_v58  ;;  %v1088_v1 = vld [vmem:[#allocation8 + $0x1a8] sm:$0xf]  ;;  %v1151_v4 = vld [vmem:[#allocation8 + $0xac] sm:$0xf]  ;;  %v962_v5 = vld [vmem:[#allocation8 + $0xb8] sm:$0xf0] }
  0x47   :  { %v1090_v9 = vld [vmem:[#allocation8 + $0x1b8] sm:$0xf0]  ;;  %v944_v10 = vld [vmem:[#allocation8 + $0x88] sm:$0xf]  ;;  %v1149_v12 = vld [vmem:[#allocation8 + $0x94] sm:$0xf0] }
  0x48   :  { %768 = vmatpush.bf16.msrb.mxu1 %v1053_v63  ;;  %730 = vmatpush.bf16.msra.mxu2 %v905_v3  ;;  %v960_v63 = vld [vmem:[#allocation8 + $0xa8] sm:$0xf]  ;;  %v1185_v3 = vld [vmem:[#allocation8 + $0x1b4] sm:$0xf0]  ;;  %v946_v16 = vld [vmem:[#allocation8 + $0x98] sm:$0xf0]  ;;  %v945_v18 = vor.u32 %v1149_v12, %v944_v10 }
  0x49   :  { %743 = vmatpush.bf16.msra.mxu3 %v1033_v7  ;;  %756 = vmatpush.bf16.msrb.mxu0 %v909_v8  ;;  %v961_v2 = vor.u32 %v1153_v0, %v960_v63  ;;  %v1089_v6 = vor.u32 %v1185_v3, %v1088_v1  ;;  %v965_v7 = vor.u32 %v1151_v4, %v962_v5  ;;  %v1183_v8 = vld [vmem:[#allocation8 + $0x1ac] sm:$0xf]  ;;  %v1072_v13 = vld [vmem:[#allocation8 + $0x188] sm:$0xf]  ;;  %v1181_v14 = vld [vmem:[#allocation8 + $0x194] sm:$0xf0] }
  0x4a   :  { %v1179_v17 = vld [vmem:[#allocation8 + $0x18c] sm:$0xf]  ;;  %v1145_v28 = vld [vmem:[#allocation8 + $0x74] sm:$0xf0]  ;;  %v1056_v29 = vld [vmem:[#allocation8 + $0x168] sm:$0xf] }
  0x4b   :  { %v1177_v33 = vld [vmem:[#allocation8 + $0x174] sm:$0xf0]  ;;  %v1143_v34 = vld [vmem:[#allocation8 + $0x6c] sm:$0xf]  ;;  %v930_v36 = vld [vmem:[#allocation8 + $0x78] sm:$0xf0] }
  0x4c   :  { %769 = vmatpush.bf16.msrb.mxu1 %v1037_v11  ;;  %731 = vmatpush.bf16.msra.mxu2 %v889_v15  ;;  %v1093_v11 = vor.u32 %v1183_v8, %v1090_v9  ;;  %v1147_v15 = vld [vmem:[#allocation8 + $0x8c] sm:$0xf]  ;;  %v1057_v35 = vor.u32 %v1177_v33, %v1056_v29  ;;  %v1058_v38 = vld [vmem:[#allocation8 + $0x178] sm:$0xf0]  ;;  %v912_v43 = vld [vmem:[#allocation8 + $0x48] sm:$0xf] }
  0x4d   :  { %744 = vmatpush.bf16.msra.mxu3 %v1017_v19  ;;  %757 = vmatpush.bf16.msrb.mxu0 %v893_v20  ;;  %v1073_v19 = vor.u32 %v1181_v14, %v1072_v13  ;;  %v1074_v20 = vld [vmem:[#allocation8 + $0x198] sm:$0xf0]  ;;  %v1141_v44 = vld [vmem:[#allocation8 + $0x54] sm:$0xf0]  ;;  %v1040_v45 = vld [vmem:[#allocation8 + $0x148] sm:$0xf] }
  0x4e   :  { %v1077_v26 = vor.u32 %v1179_v17, %v1074_v20  ;;  %v913_v47 = vor.u32 %v1141_v44, %v912_v43  ;;  %v1139_v49 = vld [vmem:[#allocation8 + $0x4c] sm:$0xf]  ;;  %v896_v56 = vld [vmem:[#allocation8 + $0x28] sm:$0xf]  ;;  %v1137_v57 = vld [vmem:[#allocation8 + $0x34] sm:$0xf0] }
  0x4f   :  { %v1167_v63 = vld [vmem:[#allocation8 + $0x12c] sm:$0xf]  ;;  %v1026_v0 = vld [vmem:[#allocation8 + $0x138] sm:$0xf0]  ;;  %v897_v1 = vor.u32 %v1137_v57, %v896_v56  ;;  %v880_v3 = vld [vmem:[#allocation8 + $0x8] sm:$0xf] }
  0x50   :  { %770 = vmatpush.bf16.msrb.mxu1 %v1021_v23  ;;  %732 = vmatpush.bf16.msra.mxu2 %v873_v27  ;;  %v949_v23 = vor.u32 %v1147_v15, %v946_v16  ;;  %v928_v27 = vld [vmem:[#allocation8 + $0x68] sm:$0xf]  ;;  %v1133_v5 = vld [vmem:[#allocation8 + $0x14] sm:$0xf0]  ;;  %v1029_v9 = vor.u32 %v1167_v63, %v1026_v0  ;;  %v1131_v10 = vld [vmem:[#allocation8 + $0xc] sm:$0xf] }
  0x51   :  { %745 = vmatpush.bf16.msra.mxu3 %v1001_v31  ;;  %758 = vmatpush.bf16.msrb.mxu0 %v877_v32  ;;  %v929_v32 = vor.u32 %v1145_v28, %v928_v27  ;;  %v1163_v14 = vld [vmem:[#allocation8 + $0x10c] sm:$0xf]  ;;  %v1010_v15 = vld [vmem:[#allocation8 + $0x118] sm:$0xf0]  ;;  %v881_v17 = vor.u32 %v1133_v5, %v880_v3  ;;  %v395_v43 = vld [vmem:[#allocation10] sm:$0xf] }
  0x52   :  { %v1013_v20 = vor.u32 %v1163_v14, %v1010_v15  ;;  %v398_v44 = vperm.slane %v395_v43, 1  ;;  %v400_v56 = vperm.slane %v395_v43, 3  ;;  %v399_v63 = vperm.slane %v395_v43, 2 }
  0x54   :  { %771 = vmatpush.bf16.msrb.mxu1 %v1005_v37  ;;  %777 = vmatpush.bf16.msrb.mxu2 %v993_v41  ;;  %v1175_v37 = vld [vmem:[#allocation8 + $0x16c] sm:$0xf]  ;;  %v933_v41 = vor.u32 %v1143_v34, %v930_v36 }
  0x55   :  { %790 = vmatpush.bf16.msrb.mxu3 %v1121_v42  ;;  %803 = vmatpush.bf16.msra.mxu0 %v997_v46  ;;  %v1061_v42 = vor.u32 %v1175_v37, %v1058_v38  ;;  %v1173_v46 = vld [vmem:[#allocation8 + $0x154] sm:$0xf0] }
  0x56   :  { %v1041_v48 = vor.u32 %v1173_v46, %v1040_v45 }
  0x58   :  { %816 = vmatpush.bf16.msra.mxu1 %v1125_v50  ;;  %778 = vmatpush.bf16.msrb.mxu2 %v977_v51  ;;  %v914_v50 = vld [vmem:[#allocation8 + $0x58] sm:$0xf0]  ;;  %v1171_v51 = vld [vmem:[#allocation8 + $0x14c] sm:$0xf] }
  0x59   :  { %791 = vmatpush.bf16.msrb.mxu3 %v1105_v55  ;;  %804 = vmatpush.bf16.msra.mxu0 %v981_v61  ;;  %v917_v54 = vor.u32 %v1139_v49, %v914_v50  ;;  %v1042_v55 = vld [vmem:[#allocation8 + $0x158] sm:$0xf0]  ;;  %v1135_v61 = vld [vmem:[#allocation8 + $0x2c] sm:$0xf]  ;;  %v397_v49 = vperm.slane %v395_v43, 0 }
  0x5a   :  { %v1045_v58 = vor.u32 %v1171_v51, %v1042_v55 }
  0x5c   :  { %817 = vmatpush.bf16.msra.mxu1 %v1109_v62  ;;  %779 = vmatpush.bf16.msrb.mxu2 %v961_v2  ;;  %v898_v62 = vld [vmem:[#allocation8 + $0x38] sm:$0xf0] }
  0x5d   :  { %792 = vmatpush.bf16.msrb.mxu3 %v1089_v6  ;;  %805 = vmatpush.bf16.msra.mxu0 %v965_v7  ;;  %v901_v4 = vor.u32 %v1135_v61, %v898_v62  ;;  %v1008_v6 = vld [vmem:[#allocation8 + $0x108] sm:$0xf]  ;;  %v1165_v7 = vld [vmem:[#allocation8 + $0x114] sm:$0xf0] }
  0x60   :  { %818 = vmatpush.bf16.msra.mxu1 %v1093_v11  ;;  %780 = vmatpush.bf16.msrb.mxu2 %v945_v18  ;;  %v882_v11 = vld [vmem:[#allocation8 + $0x18] sm:$0xf0]  ;;  %v1009_v18 = vor.u32 %v1165_v7, %v1008_v6 }
  0x61   :  { %793 = vmatpush.bf16.msrb.mxu3 %v1073_v19  ;;  %806 = vmatpush.bf16.msra.mxu0 %v949_v23  ;;  %v885_v19 = vor.u32 %v1131_v10, %v882_v11 }
  0x64   :  { %819 = vmatpush.bf16.msra.mxu1 %v1077_v26  ;;  %781 = vmatpush.bf16.msrb.mxu2 %v929_v32 }
  0x65   :  { %794 = vmatpush.bf16.msrb.mxu3 %v1057_v35  ;;  %807 = vmatpush.bf16.msra.mxu0 %v933_v41 }
  0x68   :  { %820 = vmatpush.bf16.msra.mxu1 %v1061_v42  ;;  %782 = vmatpush.bf16.msrb.mxu2 %v913_v47 }
  0x69   :  { %795 = vmatpush.bf16.msrb.mxu3 %v1041_v48  ;;  %808 = vmatpush.bf16.msra.mxu0 %v917_v54 }
  0x6c   :  { %821 = vmatpush.bf16.msra.mxu1 %v1045_v58  ;;  %783 = vmatpush.bf16.msrb.mxu2 %v897_v1 }
  0x6d   :  { %809 = vmatpush.bf16.msra.mxu0 %v901_v4 }
  0x70   :  { %822 = vmatpush.bf16.msra.mxu1 %v1029_v9  ;;  %784 = vmatpush.bf16.msrb.mxu2 %v881_v17 }
  0x71   :  { %810 = vmatpush.bf16.msra.mxu0 %v885_v19 }
  0x74   :  { %823 = vmatpush.bf16.msra.mxu1 %v1013_v20 }
  0xbc   :  { %v274_v21 = vpop.f32.mrf.mxu0  ;;  %v287_v22 = vpop.f32.mrf.mxu1 }
  0xbd   :  { %v275_v24 = vadd.f32 %v274_v21, %v207_v59  ;;  %v288_v25 = vadd.f32 %v287_v22, %v208_v60  ;;  %v1024_v59 = vld [vmem:[#allocation8 + $0x128] sm:$0xf]  ;;  %v1169_v60 = vld [vmem:[#allocation8 + $0x134] sm:$0xf0] }
  0xbe   :  { %v1025_v2 = vor.u32 %v1169_v60, %v1024_v59 }
  0xbf   :  { %v291_v30 = vsub.f32 0.0, %v275_v24  ;;  %v292_v31 = vsub.f32 0.0, %v288_v25 }
  0xc0   :  { %796 = vmatpush.bf16.msrb.mxu3 %v1025_v2 }
  0xc1   :  { %v293_v39 = vmul.f32 1.442695, %v291_v30  ;;  %v295_v40 = vmul.f32 1.442695, %v292_v31 }
  0xc3   :  { %1204 = vpow2.f32 %v293_v39 }
  0xc4   :  { %1206 = vpow2.f32 %v295_v40  ;;  %v276_v52 = vpop.f32.mrf.mxu0  ;;  %v289_v53 = vpop.f32.mrf.mxu1  ;;  %797 = vmatpush.bf16.msrb.mxu3 %v1009_v18 }
  0xc9   :  { %v1205_v8 = vpop.eup %1204 }
  0xca   :  { %v1207_v12 = vpop.eup %1206  ;;  %v297_v13 = vadd.f32 1.0, %v1205_v8 }
  0xcb   :  { %v298_v16 = vadd.f32 1.0, %v1207_v12 }
  0xcc   :  { %1208 = vrcp.f32 %v297_v13  ;;  %v310_v27 = vand.u32 2147483648, %v297_v13  ;;  %v308_v29 = vand.u32 2147483647, %v297_v13  ;;  %vm304_vm10 = vweird.f32 %v297_v13 }
  0xcd   :  { %1210 = vrcp.f32 %v298_v16  ;;  %v325_v30 = vand.u32 2147483648, %v298_v16  ;;  %v323_v32 = vand.u32 2147483647, %v298_v16  ;;  %vm319_vm12 = vweird.f32 %v298_v16 }
  0xce   :  { %v311_v34 = vor.u32 1.1754944e-38, %v310_v27  ;;  %vm309_vm13 = vcmp.eq.f32.partialorder %v308_v29, 8.507059e+37 }
  0xcf   :  { %v326_v37 = vor.u32 1.1754944e-38, %v325_v30  ;;  %vm324_vm15 = vcmp.eq.f32.partialorder %v323_v32, 8.507059e+37 }
  0xd2   :  { %v1209_v21 = vpop.eup %1208 }
  0xd3   :  { %v1211_v22 = vpop.eup %1210  ;;  %v300_v23 = vmul.f32 %v1209_v21, %v297_v13  ;;  %vm305_vm8 = vweird.f32 %v1209_v21 }
  0xd4   :  { %v315_v24 = vmul.f32 %v1211_v22, %v298_v16  ;;  %vm320_vm9 = vweird.f32 %v1211_v22  ;;  %vm306_vm11 = vmor %vm304_vm10, %vm305_vm8 }
  0xd5   :  { %v301_v25 = vsub.f32 1.0, %v300_v23  ;;  %vm321_vm14 = vmor %vm319_vm12, %vm320_vm9 }
  0xd6   :  { %v316_v26 = vsub.f32 1.0, %v315_v24 }
  0xd7   :  { %v302_v28 = vmul.f32 %v1209_v21, %v301_v25 }
  0xd8   :  { %v317_v31 = vmul.f32 %v1211_v22, %v316_v26 }
  0xd9   :  { %v303_v33 = vadd.f32 %v1209_v21, %v302_v28 }
  0xda   :  { %v318_v35 = vadd.f32 %v1211_v22, %v317_v31 }
  0xdb   :  { %v307_v36 = vsel %vm306_vm11, %v1209_v21, %v303_v33 }
  0xdc   :  { %v312_v38 = vsel %vm309_vm13, %v311_v34, %v307_v36  ;;  %v322_v39 = vsel %vm321_vm14, %v1211_v22, %v318_v35 }
  0xdd   :  { %v329_v40 = vpack.c.bf16 %v312_v38, %v312_v38  ;;  %v327_v41 = vsel %vm324_vm15, %v326_v37, %v322_v39 }
  0xde   :  { %v330_v42 = vpack.c.bf16 %v327_v41, %v327_v41 }
  0xdf   :  { %733 = vmatmul.bf16.vlgmr.msra.gmra.mxu2 %v329_v40  ;;  %759 = vmatmul.bf16.vlgmr.msrb.gmra.mxu0 %v329_v40 }
  0xe0   :  { %746 = vmatmul.bf16.vlgmr.msra.gmra.mxu3 %v330_v42  ;;  %772 = vmatmul.bf16.vlgmr.msrb.gmra.mxu1 %v330_v42 }
  0xef   :  { %785 = vmatmul.bf16.vlgmr.msrb.gmra.mxu2 %v329_v40  ;;  %811 = vmatmul.bf16.vlgmr.msra.gmra.mxu0 %v329_v40 }
  0xf0   :  { %798 = vmatmul.bf16.vlgmr.msrb.gmra.mxu3 %v330_v42  ;;  %824 = vmatmul.bf16.vlgmr.msra.gmra.mxu1 %v330_v42 }
 0x15c   :  { %v760_v45 = vpop.f32.mrf.mxu0 }
 0x15d   :  { %v761_v46 = vadd.f32 %v760_v45, %v398_v44  ;;  %v773_v47 = vpop.f32.mrf.mxu1 }
 0x15f   :  { %v774_v48 = vadd.f32 %v773_v47, %v761_v46 }
 0x161   :  { %830 = vst [vmem:[#allocation11 + $0x8] sm:$0xff] %v774_v48 }
 0x162   :  { %v734_v50 = vpop.f32.mrf.mxu2 }
 0x163   :  { %v735_v51 = vadd.f32 %v734_v50, %v397_v49  ;;  %v747_v52 = vpop.f32.mrf.mxu3 }
 0x164   :  { %v762_v53 = vpop.f32.mrf.mxu0 }
 0x165   :  { %v748_v54 = vadd.f32 %v747_v52, %v735_v51  ;;  %v775_v55 = vpop.f32.mrf.mxu1 }
 0x167   :  { %829 = vst [vmem:[#allocation11] sm:$0xff] %v748_v54 }
 0x16a   :  { %v736_v57 = vpop.f32.mrf.mxu2 }
 0x16b   :  { %v749_v58 = vpop.f32.mrf.mxu3 }
 0x16c   :  { %v812_v59 = vpop.f32.mrf.mxu0 }
 0x16d   :  { %v813_v60 = vadd.f32 %v812_v59, %v400_v56  ;;  %v825_v61 = vpop.f32.mrf.mxu1 }
 0x16f   :  { %v826_v62 = vadd.f32 %v825_v61, %v813_v60 }
 0x171   :  { %832 = vst [vmem:[#allocation11 + $0x18] sm:$0xff] %v826_v62 }
 0x172   :  { %v786_v0 = vpop.f32.mrf.mxu2 }
 0x173   :  { %v787_v1 = vadd.f32 %v786_v0, %v399_v63  ;;  %v799_v2 = vpop.f32.mrf.mxu3 }
 0x174   :  { %v814_v3 = vpop.f32.mrf.mxu0 }
 0x175   :  { %v800_v4 = vadd.f32 %v799_v2, %v787_v1  ;;  %v827_v5 = vpop.f32.mrf.mxu1 }
 0x177   :  { %831 = vst [vmem:[#allocation11 + $0x10] sm:$0xff] %v800_v4 }
 0x178   :  { %843 = dma.vmem_to_hbm [thread:$0]  %s839_s4, 512, %s841_s21, [#allocation4]  }
 0x17a   :  { %v788_v6 = vpop.f32.mrf.mxu2 }
 0x17b   :  { %v801_v7 = vpop.f32.mrf.mxu3 }
 0x17c   :  { %1362 = dma.done.wait [#allocation4], 512  }
 0x17d   :  { %1363 = vsyncadd [#allocation4], 4294966784 }
 0x17e   :  { %848 = vsyncpa [#allocation3], 1 }
 0x17f   :  { %849 = vsyncpa [#allocation6], 1 }
 0x180   :  { %850 = vsyncpa [#allocation9], 1 }
 0x181   :  { %851 = vsyncpa [#allocation4], 1 }

</bundles_post_ra>
